<compile_context>
chip_gen: v7x
topology: tpu7x:2x2x1
jax: 0.10.0
libtpu: 0.0.40
codegen_flags: <defaults>
</compile_context>

<pallas_src>
import math

import numpy as np
import jax
import jax.numpy as jnp
from jax import lax
from jax.experimental import pallas as pl
from jax.experimental.pallas import tpu as pltpu

EPS = 1e-5  # PyTorch BatchNorm2d default eps


def _rup(n, k):
    return -(-n // k) * k


# --------------------------------------------------------------------------
# pltpu.roll convention probe (one tiny setup kernel; both stages then use the
# same convention by construction, so a backend flip cannot desynchronize).
# --------------------------------------------------------------------------
def _roll_matches_numpy():
    """True iff pltpu.roll(x, s, axis) == np.roll(x, s, axis) on this backend."""

    def k(x_ref, o_ref):
        o_ref[...] = pltpu.roll(x_ref[...], shift=1, axis=1)

    x = jnp.tile(lax.iota(jnp.float32, 128)[None, :], (8, 1))
    y = pl.pallas_call(k, out_shape=jax.ShapeDtypeStruct((8, 128), jnp.float32))(x)
    v = int(round(float(y[0, 0])))
    if v == 127:
        return True    # out[i] = in[i - shift]   (numpy convention)
    if v == 1:
        return False   # out[i] = in[i + shift]
    raise AssertionError(f"unexpected pltpu.roll probe value: {v}")


def _shifted(v, s, size, np_roll):
    """Return w with w[:, m] = v[:, (m + s) mod size] (lane-axis shift)."""
    if s % size == 0:
        return v
    shift = (-s) % size if np_roll else s % size
    return pltpu.roll(v, shift=shift, axis=1)


# --------------------------------------------------------------------------
# Fused whole-network Pallas kernel (one image per grid step)
# --------------------------------------------------------------------------
def make_encoder_kernel(plan):
    stages = plan["stages"]
    np_roll = plan["np_roll"]

    def rd(slab_ref, ent):
        off, r, c = ent                      # 8-aligned static row offset
        return slab_ref[pl.ds(off, r), pl.ds(0, c)]

    def kernel(x_ref, slab_ref, o_ref, h_ref):
        cur = x_ref[0]                       # (C_in0, Msp0) image activation

        for st in stages:
            Hs, Ws = st["H"], st["W"]
            Msp, Mop = st["Msp"], st["Mop"]  # padded lane extents (x128)
            Ho, Wo = Hs // 2, Ws // 2
            G0, Gb, CP = st["G0"], st["Gb"], st["CP"]
            C_in, C_out = st["C_in"], st["C_out"]

            # in-kernel lane coordinates: replaces the streamed tap masks
            lane = lax.broadcasted_iota(jnp.int32, (1, Msp), 1)
            yy = lane // Ws
            xx = lane - yy * Ws

            x_in = cur
            # dense-feature scratch: zero it, drop the stage input in slot 0
            h_ref[...] = jnp.zeros_like(h_ref)
            h_ref[pl.ds(0, C_in), pl.ds(0, Msp)] = x_in

            for j, blk in enumerate(st["blocks"]):
                h = h_ref[pl.ds(0, CP), pl.ds(0, Msp)]
                s1 = rd(slab_ref, blk["s1"])
                t1 = rd(slab_ref, blk["t1"])
                a = jnp.maximum(h * s1 + t1, 0.0)          # bn1 + ReLU
                u = jnp.dot(rd(slab_ref, blk["w1"]), a,    # ONE full-K 1x1 dot
                            preferred_element_type=jnp.float32)
                s2 = rd(slab_ref, blk["s2"])
                t2 = rd(slab_ref, blk["t2"])
                v = jnp.maximum(u * s2 + t2, 0.0)          # bn2 + ReLU

                # 3x3 conv (pad=1): ONE MXU dot for all 9 taps, then shift /
                # mask / sum 8-aligned row slices of the result.
                p = jnp.dot(rd(slab_ref, blk["w2"]), v,
                            preferred_element_type=jnp.float32)   # (9*Gb, Msp)
                o = None
                tap = 0
                for dy in (-1, 0, 1):
                    for dx in (-1, 0, 1):
                        rows = p[tap * Gb:(tap + 1) * Gb, :]
                        rows = _shifted(rows, dy * Ws + dx, Msp, np_roll)
                        valid = ((yy + dy >= 0) & (yy + dy < Hs) &
                                 (xx + dx >= 0) & (xx + dx < Ws))
                        rows = jnp.where(valid, rows, 0.0)
                        o = rows if o is None else o + rows
                        tap += 1
                # "concat" = write the new channel group at its 8-aligned slot
                h_ref[pl.ds(G0 + j * Gb, Gb), pl.ds(0, Msp)] = o

            # transition: bn + ReLU + 1x1 as a single full-K dot
            h = h_ref[pl.ds(0, CP), pl.ds(0, Msp)]
            sT = rd(slab_ref, st["sT"])
            tT = rd(slab_ref, st["tT"])
            y = jnp.dot(rd(slab_ref, st["wT"]),
                        jnp.maximum(h * sT + tT, 0.0),
                        preferred_element_type=jnp.float32)       # (C_out, Msp)

            # residual branch, folded into the same pooling matmul
            if st["res_type"] == "conv":
                idn = jnp.dot(rd(slab_ref, st["rw"]), x_in,
                              preferred_element_type=jnp.float32)
                even = (yy % 2 == 0) & (xx % 2 == 0)
                idn = jnp.where(even, idn * 4.0, 0.0)  # stride-2 pick == even*4 + avg
            else:  # "avgpool" residual (C_in == C_out)
                idn = x_in

            # 2x2 avg-pool as one dot against an iota-generated (Msp, Mop)
            # matrix (no O(M^2) HBM operand).  Padded / junk rows never match.
            mi = lax.broadcasted_iota(jnp.int32, (Msp, Mop), 0)
            mj = lax.broadcasted_iota(jnp.int32, (Msp, Mop), 1)
            py = mi // Ws
            px = mi - py * Ws
            pool = jnp.where((py // 2) * Wo + (px // 2) == mj,
                             0.25, 0.0).astype(jnp.float32)
            cur = jnp.maximum(
                jnp.dot(y + idn, pool, preferred_element_type=jnp.float32), 0.0)

        # conv_final (1x1 + bias) + 2-D positional encoding
        out = jnp.dot(rd(slab_ref, plan["fw"]), cur,
                      preferred_element_type=jnp.float32)
        out = out + rd(slab_ref, plan["fb"]) + rd(slab_ref, plan["pe"])
        o_ref[0] = out

    return kernel


def encoder_forward(x_nchw, prep):
    plan, slab = prep["plan"], prep["slab"]
    B, Cin, H, W = x_nchw.shape
    st0 = plan["stages"][0]
    Msp0 = st0["Msp"]
    # NCHW -> (B, C, H*W): channels on sublanes, flattened spatial on lanes.
    x = x_nchw.reshape(B, Cin, H * W)
    if Msp0 > H * W:                       # keep lane extent a multiple of 128
        x = jnp.pad(x, ((0, 0), (0, 0), (0, Msp0 - H * W)))
    hidden, Mo_f = plan["hidden"], plan["Mo_final"]

    out = pl.pallas_call(
        make_encoder_kernel(plan),
        out_shape=jax.ShapeDtypeStruct((B, hidden, Mo_f), jnp.float32),
        grid_spec=pltpu.PrefetchScalarGridSpec(
            num_scalar_prefetch=0,
            grid=(B,),                                        # one image / step
            in_specs=[pl.BlockSpec((1, Cin, Msp0), lambda b: (b, 0, 0)),
                      pl.BlockSpec(slab.shape, lambda b: (0, 0))],
            out_specs=pl.BlockSpec((1, hidden, Mo_f), lambda b: (b, 0, 0)),
            scratch_shapes=[pltpu.VMEM((plan["CP_max"], plan["Msp_max"]),
                                       jnp.float32)]),
        compiler_params=pltpu.CompilerParams(
            dimension_semantics=("parallel",)),   # both TensorCores on v7x
    )(x, slab)
    # (B, hidden, H*W) -> (B, H*W, hidden)  == view(B,C,HW).permute(0,2,1)
    return jnp.transpose(out, (0, 2, 1))


# --------------------------------------------------------------------------
# Host-side parameter packing (one slab, slot-padded channel layout)
# --------------------------------------------------------------------------
class _SlabPacker:
    """Packs many small 2-D operands into one (R, K) f32 slab (one DMA).

    Each operand gets an 8-aligned row offset so every in-kernel read is a
    tile-aligned static slice."""

    def __init__(self):
        self._entries = []
        self._row = 0
        self._max_cols = 1

    def add(self, arr):
        arr = np.asarray(arr, np.float32)
        if arr.ndim == 1:
            arr = arr[:, None]
        off = self._row
        self._entries.append((off, arr))
        self._row += _rup(arr.shape[0], 8)
        self._max_cols = max(self._max_cols, arr.shape[1])
        return (off, arr.shape[0], arr.shape[1])

    def finalize(self):
        slab = np.zeros((max(self._row, 8), self._max_cols), np.float32)
        for off, arr in self._entries:
            slab[off:off + arr.shape[0], :arr.shape[1]] = arr
        return jnp.asarray(slab)


def bn_scale_shift(p):
    gamma = np.asarray(p["gamma"], np.float32)
    var = np.asarray(p["var"], np.float32)
    beta = np.asarray(p["beta"], np.float32)
    mean = np.asarray(p["mean"], np.float32)
    s = gamma / np.sqrt(var + EPS)
    return s, beta - mean * s


def positional_encoding_2d(hidden, H, W):
    assert hidden % 2 == 0, "PositionalEncoding2D requires an even hidden dim"
    y = jnp.arange(H, dtype=jnp.float32)[:, None] * jnp.ones((1, W), jnp.float32)
    x = jnp.ones((H, 1), jnp.float32) * jnp.arange(W, dtype=jnp.float32)[None, :]
    div = jnp.exp(jnp.arange(0, hidden, 2, dtype=jnp.float32)
                  * (-math.log(10000.0) / hidden))
    argy = div[:, None, None] * y[None]
    argx = div[:, None, None] * x[None]
    pe = jnp.zeros((hidden, H, W), jnp.float32)
    pe = pe.at[0::2].set(jnp.sin(argy) + jnp.sin(argx))
    pe = pe.at[1::2].set(jnp.cos(argy) + jnp.cos(argx))
    return pe.reshape(hidden, H * W)


def prepare_params(params, H, W):
    """PyTorch-shaped params -> {plan (static config), slab (one packed array)}."""
    np_roll = _roll_matches_numpy()
    packer = _SlabPacker()
    stages_plan = []
    cur_H, cur_W = H, W

    for dn, res in zip(params["densenets"], params["residuals"]):
        if res["type"] == "none":
            # TODO(synk): residual=None only arises for a shape-inconsistent
            # config of the original module (it errors in PyTorch too).
            raise ValueError("residual=None configuration is not supported")
        n_blocks = len(dn["blocks"])
        C_in = int(np.asarray(dn["blocks"][0]["w1"]).shape[1])
        growth = int(np.asarray(dn["blocks"][0]["w2"]).shape[0])
        G0, Gb = _rup(C_in, 8), _rup(growth, 8)
        CP = G0 + n_blocks * Gb
        # dense channel index -> 8-aligned slot index in the feature scratch
        slots = np.concatenate(
            [np.arange(C_in)]
            + [G0 + b * Gb + np.arange(growth) for b in range(n_blocks)])

        blocks_plan = []
        for j, bp in enumerate(dn["blocks"]):
            C_j = C_in + j * growth
            s1, t1 = bn_scale_shift(bp["bn1"])
            s2, t2 = bn_scale_shift(bp["bn2"])
            w1 = np.asarray(bp["w1"], np.float32)             # (inter, C_j)
            inter = w1.shape[0]
            w2 = np.asarray(bp["w2"], np.float32)             # (g, inter, 3, 3)
            s1p = np.zeros((CP, 1), np.float32); s1p[slots[:C_j], 0] = s1
            t1p = np.zeros((CP, 1), np.float32); t1p[slots[:C_j], 0] = t1
            w1p = np.zeros((inter, CP), np.float32); w1p[:, slots[:C_j]] = w1
            w2t = np.transpose(w2, (2, 3, 0, 1)).reshape(9, growth, inter)
            w2p = np.zeros((9 * Gb, inter), np.float32)       # tap rows 8-padded
            for t in range(9):
                w2p[t * Gb:t * Gb + growth] = w2t[t]
            blocks_plan.append(dict(
                s1=packer.add(s1p), t1=packer.add(t1p), w1=packer.add(w1p),
                s2=packer.add(s2.reshape(-1, 1)),
                t2=packer.add(t2.reshape(-1, 1)),
                w2=packer.add(w2p)))

        sT, tT = bn_scale_shift(dn["trans_bn"])
        wT = np.asarray(dn["trans_w"], np.float32)            # (C_out, C_total)
        C_out = wT.shape[0]
        sTp = np.zeros((CP, 1), np.float32); sTp[slots, 0] = sT
        tTp = np.zeros((CP, 1), np.float32); tTp[slots, 0] = tT
        wTp = np.zeros((C_out, CP), np.float32); wTp[:, slots] = wT

        Ms = cur_H * cur_W
        st = dict(H=cur_H, W=cur_W, Msp=_rup(Ms, 128),
                  Mo=(cur_H // 2) * (cur_W // 2),
                  C_in=C_in, C_out=C_out, G0=G0, Gb=Gb, CP=CP,
                  res_type=res["type"], blocks=blocks_plan,
                  sT=packer.add(sTp), tT=packer.add(tTp), wT=packer.add(wTp))
        if res["type"] == "conv":
            st["rw"] = packer.add(np.asarray(res["w"], np.float32))
        stages_plan.append(st)
        cur_H //= 2
        cur_W //= 2

    # padded output lane width of stage i feeds stage i+1; last stage exact.
    for i, st in enumerate(stages_plan):
        st["Mop"] = (stages_plan[i + 1]["Msp"] if i + 1 < len(stages_plan)
                     else st["Mo"])

    hidden = int(np.asarray(params["final_w"]).shape[0])
    pe = np.asarray(positional_encoding_2d(hidden, cur_H, cur_W), np.float32)
    plan = dict(stages=stages_plan, hidden=hidden,
                Mo_final=cur_H * cur_W, np_roll=np_roll,
                CP_max=max(s["CP"] for s in stages_plan),
                Msp_max=max(s["Msp"] for s in stages_plan),
                fw=packer.add(np.asarray(params["final_w"], np.float32)),
                fb=packer.add(np.asarray(params["final_b"],
                                         np.float32).reshape(-1, 1)),
                pe=packer.add(pe))
    return dict(plan=plan, slab=packer.finalize())


# --------------------------------------------------------------------------
# Deterministic parameter initialization (PyTorch-shaped weights)
# --------------------------------------------------------------------------
def init_params(key, num_densenets, num_blocks, growth, in_ch, hidden_dim,
                bottleneck_width=4):
    keys = iter(jax.random.split(key, 512))
    nk = lambda: next(keys)

    def conv_w(c_out, c_in, k=1):
        fan_in = c_in * k * k
        shape = (c_out, c_in) if k == 1 else (c_out, c_in, k, k)
        return jax.random.normal(nk(), shape, jnp.float32) / np.sqrt(fan_in)

    def bn_p(c):
        return dict(gamma=jax.random.uniform(nk(), (c,), jnp.float32, 0.5, 1.5),
                    beta=0.1 * jax.random.normal(nk(), (c,), jnp.float32),
                    mean=0.1 * jax.random.normal(nk(), (c,), jnp.float32),
                    var=jax.random.uniform(nk(), (c,), jnp.float32, 0.5, 1.5))

    params = dict(densenets=[], residuals=[])
    cur = in_ch
    for _ in range(num_densenets):
        dn = dict(blocks=[])
        ch = cur
        inter = int(growth * bottleneck_width / 4) * 4
        for _ in range(num_blocks):
            dn["blocks"].append(dict(bn1=bn_p(ch), w1=conv_w(inter, ch),
                                     bn2=bn_p(inter), w2=conv_w(growth, inter, 3)))
            ch += growth
        dn["trans_bn"] = bn_p(ch)
        dn["trans_w"] = conv_w(ch // 2, ch)
        out_ch = ch // 2
        params["densenets"].append(dn)
        if cur != out_ch:
            params["residuals"].append(dict(type="conv", w=conv_w(out_ch, cur)))
        else:
            params["residuals"].append(
                dict(type="avgpool" if num_densenets > 1 else "none"))
        cur = out_ch
    params["final_w"] = conv_w(hidden_dim, cur)
    params["final_b"] = 0.1 * jax.random.normal(nk(), (hidden_dim,), jnp.float32)
    return params


# --------------------------------------------------------------------------
# Pure-JAX reference forward (independent implementation, for verification)
# --------------------------------------------------------------------------
def _ref_bn(x, p):
    s = p["gamma"] / jnp.sqrt(p["var"] + EPS)
    b = p["beta"] - p["mean"] * s
    return x * s[None, :, None, None] + b[None, :, None, None]


def _ref_conv(x, w, stride=1, padding=0, bias=None):
    if w.ndim == 2:
        w = w[:, :, None, None]
    out = lax.conv_general_dilated(
        x, w, window_strides=(stride, stride),
        padding=((padding, padding), (padding, padding)),
        dimension_numbers=("NCHW", "OIHW", "NCHW"),
        precision=lax.Precision.HIGHEST)
    if bias is not None:
        out = out + bias[None, :, None, None]
    return out


def _ref_avgpool2(x):
    B, C, H, W = x.shape
    return x.reshape(B, C, H // 2, 2, W // 2, 2).mean(axis=(3, 5))


def reference_forward(x, params):
    for dn, res in zip(params["densenets"], params["residuals"]):
        identity = x
        h = x
        for bp in dn["blocks"]:
            o = _ref_conv(jax.nn.relu(_ref_bn(h, bp["bn1"])), bp["w1"])
            o = _ref_conv(jax.nn.relu(_ref_bn(o, bp["bn2"])), bp["w2"], padding=1)
            h = jnp.concatenate([h, o], axis=1)
        h = _ref_avgpool2(_ref_conv(jax.nn.relu(_ref_bn(h, dn["trans_bn"])),
                                    dn["trans_w"]))
        if res["type"] == "conv":
            identity = _ref_conv(identity, res["w"], stride=2)
        else:  # "avgpool"
            identity = _ref_avgpool2(identity)
        x = jax.nn.relu(h + identity)
    x = _ref_conv(x, params["final_w"], bias=params["final_b"])
    B, C, H, W = x.shape
    pe = positional_encoding_2d(C, H, W).reshape(C, H, W)
    x = x + pe[None]
    return jnp.transpose(x.reshape(B, C, H * W), (0, 2, 1))


# --------------------------------------------------------------------------
if __name__ == "__main__":
    key = jax.random.PRNGKey(0)
    kx, kp = jax.random.split(key)

    # small config: num_densenets=2, num_blocks_per_dense=2, growth_rate=4,
    # input_channels=4, hidden_dim=32, bottleneck_width=4 (dropout eval no-op)
    B, Cin, H, W = 2, 4, 16, 16
    hidden_dim = 32
    x_nchw = jax.random.normal(kx, (B, Cin, H, W), jnp.float32)   # PyTorch NCHW
    params = init_params(kp, num_densenets=2, num_blocks=2, growth=4,
                         in_ch=Cin, hidden_dim=hidden_dim)

    prep = prepare_params(params, H, W)

    fwd = jax.jit(lambda inp: encoder_forward(inp, prep))
    out = jax.block_until_ready(fwd(x_nchw))

    # two DenseNets => 16 -> 8 -> 4 spatial; output (B, H*W, hidden)
    assert out.shape == (B, (H // 4) * (W // 4), hidden_dim), out.shape
    assert out.dtype == jnp.float32

    ref = jax.block_until_ready(reference_forward(x_nchw, params))
    np.testing.assert_allclose(np.asarray(out), np.asarray(ref),
                               rtol=5e-2, atol=5e-2)

    print("KERNEL_OK")
</pallas_src>

<mosaic_0001>
module attributes {stable_mosaic.version = 11 : i64} {
  func.func @k(%arg0: memref<8x128xf32, #tpu.memory_space<vmem>>, %arg1: memref<8x128xf32, #tpu.memory_space<vmem>>) attributes {dimension_semantics = [], scalar_prefetch = 0 : i64, scratch_operands = 0 : i64, tpu.core_type = #tpu.core_type<tc>} {
    %c0 = arith.constant 0 : index
    %c0_0 = arith.constant 0 : index
    %0 = vector.load %arg0[%c0, %c0_0] : memref<8x128xf32, #tpu.memory_space<vmem>>, vector<8x128xf32>
    %c1_i32 = arith.constant 1 : i32
    %1 = tpu.dynamic_rotate %0 by %c1_i32 dim 1 : vector<8x128xf32>, i32 -> vector<8x128xf32>
    %c0_1 = arith.constant 0 : index
    %c0_2 = arith.constant 0 : index
    %2 = vector.load %arg1[%c0_1, %c0_2] : memref<8x128xf32, #tpu.memory_space<vmem>>, vector<8x128xf32>
    tpu.vector_store %arg1[%c0_1, %c0_2], %1 {strides = array<i32>} : memref<8x128xf32, #tpu.memory_space<vmem>>, vector<8x128xf32>,
    return
  }
}

</mosaic_0001>

<bundles_post_ra>
// kernel: tpu_custom_call.1
= control target key start
LH: loop header
LB: loop body
LE: loop exit
PB: predicated region body
PF: predicated region fallthrough
CT: control target
= control target key end

     0   :  { %6 = vsyncpa [#allocation3], 0  ;;  %s128_s0 = inlined_call_operand.hbm [shape: f32[8,128], index: 0, kind: input, shape index: {}]   ;;  %s129_s1 = inlined_call_operand.hbm [shape: f32[8,128], index: 1, kind: output, shape index: {}]  }
   0x1   :  { %7 = vsyncpa [#allocation4], 0  ;;  %s91_s6 = smov [#allocation2]   ;;  %s43_s10 = scalar_lea.hbm %s128_s0, 128 }
   0x2   :  { %s14_s7 = sshll.u32 %s91_s6, 4  ;;  %p44_p0 = scmp.ne.s32.totalorder %s128_s0, %s43_s10  ;;  %s15_s7 = int_to_ptr.vmem [resolvable:$true] %s14_s7 }
   0x3   :  { %p47_p1 = scmp.lt.u32.totalorder %s43_s10, %s128_s0 }
   0x5   :  { %p49_p2 = pnand %p47_p1, %p44_p0 }
   0x7   :  { %52 = shalt.err (!%p49_p2)
}
   0x8   :  { %s53_s15 = scalar_lea.vmem %s15_s7, 128  ;;  %p58_p4 = scmp.lt.s32.totalorder %s15_s7, %s15_s7 }
   0x9   :  { %p54_p3 = scmp.ne.s32.totalorder %s15_s7, %s53_s15  ;;  %p59_p5 = scmp.lt.s32.totalorder %s53_s15, %s53_s15 }
   0xb   :  { %p60_p6 = por %p59_p5, %p58_p4 }
   0xd   :  { %p61_p7 = pnand %p60_p6, %p54_p3 }
   0xf   :  { %64 = shalt.err (!%p61_p7)
}
  0x10   :  { %17 = dma.hbm_to_vmem [thread:$0]  %s128_s0, 128, %s15_s7, [#allocation3]  }
  0x11   :  { %87 = dma.done.wait [#allocation3], 128  }
  0x12   :  { %88 = vsyncadd [#allocation3], 4294967168  ;;  %v21_v0 = vld [vmem:[#allocation2] sm:$0xff]  ;;  %s92_s18 = smov 1   ;;  %s93_s19 = smov [#allocation5]  }
  0x13   :  { %22 = vrot.lane.b32.xlu0 %v21_v0, %s92_s18  ;;  %s31_s20 = sshll.u32 %s93_s19, 4  ;;  %s32_s20 = int_to_ptr.vmem [resolvable:$true] %s31_s20 }
  0x14   :  { %s65_s21 = scalar_lea.vmem %s32_s20, 128  ;;  %p70_p9 = scmp.lt.s32.totalorder %s32_s20, %s32_s20 }
  0x15   :  { %p66_p8 = scmp.ne.s32.totalorder %s32_s20, %s65_s21  ;;  %p71_p10 = scmp.lt.s32.totalorder %s65_s21, %s65_s21 }
  0x17   :  { %p72_p11 = por %p71_p10, %p70_p9 }
  0x19   :  { %p73_p12 = pnand %p72_p11, %p66_p8 }
  0x85   :  { %v23_v1 = vpop.permute.xlu0 %22 }
  0x86   :  { %24 = vst [vmem:[#allocation5] sm:$0xff] %v23_v1 }
  0x87   :  { %76 = shalt.err (!%p73_p12)
}
  0x88   :  { %s77_s0 = scalar_lea.hbm %s129_s1, 128 }
  0x89   :  { %p78_p13 = scmp.ne.s32.totalorder %s129_s1, %s77_s0  ;;  %p81_p0 = scmp.lt.u32.totalorder %s77_s0, %s129_s1 }
  0x8b   :  { %p83_p1 = pnand %p81_p0, %p78_p13 }
  0x8d   :  { %86 = shalt.err (!%p83_p1)
}
  0x8e   :  { %34 = dma.vmem_to_hbm [thread:$0]  %s32_s20, 128, %s129_s1, [#allocation4]  }
  0x8f   :  { %89 = dma.done.wait [#allocation4], 128  }
  0x90   :  { %90 = vsyncadd [#allocation4], 4294967168 }
  0x91   :  { %38 = vsyncpa [#allocation3], 1 }
  0x92   :  { %39 = vsyncpa [#allocation4], 1 }

</bundles_post_ra>
